<compile_context>
chip_gen: v7x
topology: tpu7x:2x2x1
jax: 0.10.0
libtpu: 0.0.40
codegen_flags: <defaults>
</compile_context>

<pallas_src>
import jax
import jax.numpy as jnp
from jax.experimental import pallas as pl
from jax.experimental.pallas import tpu as pltpu


# ----------------------------------------------------------------------------- kernel ----
def _concat_bifpn_kernel(w_ref, x0_ref, x1_ref, o_ref):
    # w_ref : (2,) f32 in SMEM (already-normalized weight[0], weight[1]).
    # x0_ref, x1_ref : (TILE_C, TILE_HW) in VMEM.
    # o_ref : (2, TILE_C, TILE_HW) in VMEM  (axis 0 = source slab of the channel concat).
    w0 = w_ref[0]
    w1 = w_ref[1]
    x0 = x0_ref[...]
    x1 = x1_ref[...]
    if x0.dtype != jnp.float32:
        # Multiply in native dtype (bf16 VALU on v6e/v7x); scalar cast is free.
        w0 = w0.astype(x0.dtype)
        w1 = w1.astype(x1.dtype)
    # One full, aligned output block per program: two contiguous slab stores at
    # sublane/lane offset 0, never a mid-channel-offset store.
    o_ref[0] = (x0 * w0).astype(o_ref.dtype)
    o_ref[1] = (x1 * w1).astype(o_ref.dtype)


# ------------------------------------------------------------------- trace-time helpers ----
def _cdiv(a, b):
    return -(-a // b)


def _vmem_capacity_bytes():
    """Physical VMEM of the current chip; conservative 64 MiB (v7x per-TC) fallback."""
    try:
        cap = getattr(pltpu.get_tpu_info(), "vmem_capacity_bytes", None)
        if cap:
            return int(cap)
    except Exception:
        pass
    return 64 * 1024 * 1024


def _best_tile(dim, cap, align):
    """Full-extent block if it fits under `cap`; otherwise the aligned tile in
    [cap/2, cap] that minimizes padded total traffic (ties -> larger tile, fewer steps)."""
    if dim <= cap:
        return dim  # full-extent block is always legal regardless of alignment
    cap = max((cap // align) * align, align)
    lo = max(align, (cap // 2 // align) * align)
    best_t, best_padded = None, None
    t = lo
    while t <= cap:
        padded = _cdiv(dim, t) * t
        if best_padded is None or padded < best_padded or (padded == best_padded and t > best_t):
            best_t, best_padded = t, padded
        t += align
    return best_t


def _largest_exact_split(dim, cur_tile, align):
    """Largest `align`-multiple tile < cur_tile that divides `dim` exactly (no padding)."""
    t = ((min(cur_tile, dim) - 1) // align) * align
    while t >= align:
        if dim % t == 0:
            return t
        t -= align
    return None


def _enforce_min_programs(N, C, HW, tile_c, tile_hw, sub_pack, min_programs=4):
    """Split HW (then C) along exact divisors so the grid has >= min_programs steps:
    both v7x TensorCores get work and the pipeline can double-buffer.  Never adds padding."""
    def total(tc, thw):
        return N * _cdiv(C, tc) * _cdiv(HW, thw)

    while total(tile_c, tile_hw) < min_programs:
        t = _largest_exact_split(HW, tile_hw, 128)
        if t is not None and _cdiv(HW, t) > _cdiv(HW, tile_hw):
            tile_hw = t
            continue
        t = _largest_exact_split(C, tile_c, sub_pack)
        if t is not None and _cdiv(C, t) > _cdiv(C, tile_c):
            tile_c = t
            continue
        break  # cannot split further without padding; accept fewer programs
    return tile_c, tile_hw


# ------------------------------------------------------------------------------ wrapper ----
def concat_bifpn(x0, x1, w, epsilon=1e-4):
    """x0, x1: (N, C, H, W) arrays (same shape/dtype). w: (3,) float32 parameter."""
    assert x0.shape == x1.shape and x0.dtype == x1.dtype
    N, C, H, W = x0.shape
    HW = H * W

    # Tiny (3,)-parameter normalization stays in plain JAX (scalar glue; exact division,
    # matching the PyTorch numerics).  Folding it into the kernel is neutral except for
    # launch-overhead-dominated shapes, so we keep the robust path.
    weight = (w / (jnp.sum(w) + epsilon)).astype(jnp.float32)
    w_norm = weight[:2]  # only weight[0], weight[1] are used

    # Flatten H,W into one lane-dense axis.
    x0r = x0.reshape(N, C, HW)
    x1r = x1.reshape(N, C, HW)

    # ---- hardware-derived tile budget ---------------------------------------------------
    itemsize = jnp.dtype(x0.dtype).itemsize
    sub_pack = max(8, 32 // max(itemsize, 1))       # sublane pack: 8 f32 / 16 bf16 / 32 i8

    vmem_cap = _vmem_capacity_bytes()
    vmem_limit = min(vmem_cap * 3 // 4, 96 * 1024 * 1024)       # 48 MiB on v7x, 96 MiB v5e/v6e

    # Per-grid-step tile budget.  Double-buffered working set is
    #   2 buffers x (x0 + x1 + 2x-size output) = 8 x tile_bytes,
    # kept at ~half the scoped-VMEM limit:  4 MiB tiles on v7x (64 MiB), 8 MiB on 128 MiB parts.
    target_tile_bytes = max(1 << 20, vmem_cap // 16)
    target_elems = target_tile_bytes // itemsize

    hw_cap = 4096 if vmem_cap <= (64 << 20) else 8192           # lane-axis tile cap
    tile_hw = _best_tile(HW, hw_cap, 128)
    c_cap = max(sub_pack, target_elems // max(tile_hw, 1))      # remaining budget -> channels
    tile_c = _best_tile(C, c_cap, sub_pack)

    # Make sure v7x's two TCs both get work (and the pipeline has >1 step) for small shapes.
    tile_c, tile_hw = _enforce_min_programs(N, C, HW, tile_c, tile_hw, sub_pack, min_programs=4)

    # TODO(synk): for tiny feature maps (H*W << 128) the lane axis is masked/partial; a
    # fallback layout folding C into the lane axis would avoid that, not needed for BiFPN.

    grid = (N, _cdiv(C, tile_c), _cdiv(HW, tile_hw))

    out4 = pl.pallas_call(
        _concat_bifpn_kernel,
        out_shape=jax.ShapeDtypeStruct((N, 2, C, HW), x0.dtype),
        grid_spec=pltpu.PrefetchScalarGridSpec(
            num_scalar_prefetch=1,  # w_norm -> SMEM, passed first to kernel & index_maps
            grid=grid,
            in_specs=[
                pl.BlockSpec((None, tile_c, tile_hw),
                             lambda n, ci, hwi, w_s: (n, ci, hwi)),
                pl.BlockSpec((None, tile_c, tile_hw),
                             lambda n, ci, hwi, w_s: (n, ci, hwi)),
            ],
            out_specs=pl.BlockSpec((None, 2, tile_c, tile_hw),
                                   lambda n, ci, hwi, w_s: (n, 0, ci, hwi)),
        ),
        compiler_params=pltpu.CompilerParams(
            # All grid axes are independent -> shard across v7x's 2 TCs (no-op on v5e/v6e).
            dimension_semantics=("parallel", "parallel", "parallel"),
            vmem_limit_bytes=int(vmem_limit),
        ),
    )(w_norm, x0r, x1r)

    # (N, 2, C, HW) -> (N, 2C, H, W): contiguous reshape == channel concat, no data movement.
    return out4.reshape(N, 2 * C, H, W)


# ---------------------------------------------------------------------------- reference ----
def _reference(x0, x1, w, epsilon=1e-4):
    weight = w / (jnp.sum(w) + epsilon)
    return jnp.concatenate([weight[0] * x0, weight[1] * x1], axis=1)


if __name__ == "__main__":
    key = jax.random.PRNGKey(0)
    k0, k1, k2, k3 = jax.random.split(key, 4)

    # Parameter init per nn.Module __init__: w = ones(3), float32.
    w = jnp.ones((3,), dtype=jnp.float32)

    # Case 1: small shape from the module spec; exercises the exact-split min-programs path
    # (HW=256 split into 2x128 -> 4 grid steps, zero padding).
    N, C, H, W = 2, 4, 16, 16
    x0 = jax.random.normal(k0, (N, C, H, W), dtype=jnp.float32)
    x1 = jax.random.normal(k1, (N, C, H, W), dtype=jnp.float32)
    out = jax.block_until_ready(concat_bifpn(x0, x1, w))
    ref = _reference(x0, x1, w)
    assert out.shape == (N, 2 * C, H, W)
    assert jnp.allclose(out, ref, atol=1e-6, rtol=1e-6)

    # Case 2: typical BiFPN resolution (40x40 -> HW=1600): full-extent lane block
    # (remainder-free, previously 44% padded tail), channel axis split exactly for >=4 steps.
    N2, C2, H2, W2 = 2, 16, 40, 40
    y0 = jax.random.normal(k2, (N2, C2, H2, W2), dtype=jnp.float32)
    y1 = jax.random.normal(k3, (N2, C2, H2, W2), dtype=jnp.float32)
    out2 = jax.block_until_ready(concat_bifpn(y0, y1, w))
    ref2 = _reference(y0, y1, w)
    assert out2.shape == (N2, 2 * C2, H2, W2)
    assert jnp.allclose(out2, ref2, atol=1e-6, rtol=1e-6)

    print("KERNEL_OK")
</pallas_src>

<mosaic_0001>
module attributes {stable_mosaic.version = 11 : i64} {
  func.func @_concat_bifpn_kernel(%arg0: i32, %arg1: i32, %arg2: i32, %arg3: memref<2xf32, #tpu.memory_space<smem>>, %arg4: memref<1x4x128xf32, #tpu.memory_space<vmem>>, %arg5: memref<1x4x128xf32, #tpu.memory_space<vmem>>, %arg6: memref<1x2x4x128xf32, #tpu.memory_space<vmem>>) attributes {dimension_semantics = [#tpu.dimension_semantics<parallel>, #tpu.dimension_semantics<parallel>, #tpu.dimension_semantics<parallel>], iteration_bounds = array<i64: 2, 1, 2>, scalar_prefetch = 1 : i64, scratch_operands = 0 : i64, tpu.core_type = #tpu.core_type<tc>, window_params = [{transform_indices = @transform_0, window_bounds = array<i64: 1, 4, 128>}, {transform_indices = @transform_1, window_bounds = array<i64: 1, 4, 128>}, {transform_indices = @transform_2, window_bounds = array<i64: 1, 2, 4, 128>}]} {
    %c0 = arith.constant 0 : index
    %0 = memref.load %arg3[%c0] : memref<2xf32, #tpu.memory_space<smem>>
    %c1 = arith.constant 1 : index
    %1 = memref.load %arg3[%c1] : memref<2xf32, #tpu.memory_space<smem>>
    %c0_0 = arith.constant 0 : index
    %c0_1 = arith.constant 0 : index
    %c0_2 = arith.constant 0 : index
    %2 = vector.load %arg4[%c0_0, %c0_1, %c0_2] : memref<1x4x128xf32, #tpu.memory_space<vmem>>, vector<1x4x128xf32>
    %3 = vector.shape_cast %2 : vector<1x4x128xf32> to vector<4x128xf32>
    %c0_3 = arith.constant 0 : index
    %c0_4 = arith.constant 0 : index
    %c0_5 = arith.constant 0 : index
    %4 = vector.load %arg5[%c0_3, %c0_4, %c0_5] : memref<1x4x128xf32, #tpu.memory_space<vmem>>, vector<1x4x128xf32>
    %5 = vector.shape_cast %4 : vector<1x4x128xf32> to vector<4x128xf32>
    %6 = vector.broadcast %0 : f32 to vector<4x128xf32>
    %7 = arith.mulf %3, %6 : vector<4x128xf32>
    %c0_6 = arith.constant 0 : index
    %c0_7 = arith.constant 0 : index
    %c0_8 = arith.constant 0 : index
    %c0_9 = arith.constant 0 : index
    %8 = vector.load %arg6[%c0_6, %c0_7, %c0_8, %c0_9] : memref<1x2x4x128xf32, #tpu.memory_space<vmem>>, vector<1x1x4x128xf32>
    %9 = vector.shape_cast %8 : vector<1x1x4x128xf32> to vector<4x128xf32>
    %10 = vector.shape_cast %7 : vector<4x128xf32> to vector<1x1x4x128xf32>
    tpu.vector_store %arg6[%c0_6, %c0_7, %c0_8, %c0_9], %10 {strides = array<i32>} : memref<1x2x4x128xf32, #tpu.memory_space<vmem>>, vector<1x1x4x128xf32>,
    %11 = vector.broadcast %1 : f32 to vector<4x128xf32>
    %12 = arith.mulf %5, %11 : vector<4x128xf32>
    %c0_10 = arith.constant 0 : index
    %c1_11 = arith.constant 1 : index
    %c0_12 = arith.constant 0 : index
    %c0_13 = arith.constant 0 : index
    %13 = vector.load %arg6[%c0_10, %c1_11, %c0_12, %c0_13] : memref<1x2x4x128xf32, #tpu.memory_space<vmem>>, vector<1x1x4x128xf32>
    %14 = vector.shape_cast %13 : vector<1x1x4x128xf32> to vector<4x128xf32>
    %15 = vector.shape_cast %12 : vector<4x128xf32> to vector<1x1x4x128xf32>
    tpu.vector_store %arg6[%c0_10, %c1_11, %c0_12, %c0_13], %15 {strides = array<i32>} : memref<1x2x4x128xf32, #tpu.memory_space<vmem>>, vector<1x1x4x128xf32>,
    return
  }
  func.func @transform_0(%arg0: i32, %arg1: i32, %arg2: i32, %arg3: memref<2xf32, #tpu.memory_space<smem>>) -> (i32, i32, i32) {
    %c0_i32 = arith.constant 0 : i32
    return %arg0, %arg1, %arg2 : i32, i32, i32
  }
  func.func @transform_1(%arg0: i32, %arg1: i32, %arg2: i32, %arg3: memref<2xf32, #tpu.memory_space<smem>>) -> (i32, i32, i32) {
    %c0_i32 = arith.constant 0 : i32
    return %arg0, %arg1, %arg2 : i32, i32, i32
  }
  func.func @transform_2(%arg0: i32, %arg1: i32, %arg2: i32, %arg3: memref<2xf32, #tpu.memory_space<smem>>) -> (i32, i32, i32, i32) {
    %c0_i32 = arith.constant 0 : i32
    %c0_i32_0 = arith.constant 0 : i32
    return %arg0, %c0_i32, %arg1, %arg2 : i32, i32, i32, i32
  }
}

</mosaic_0001>

<bundles_post_ra>
// kernel: tpu_custom_call.1
= control target key start
LH: loop header
LB: loop body
LE: loop exit
PB: predicated region body
PF: predicated region fallthrough
CT: control target
= control target key end

     0   :  { %s961_s0 = inlined_call_operand.hbm [shape: f32[2], index: 0, kind: input, shape index: {}]   ;;  %s962_s1 = inlined_call_operand.hbm [shape: f32[2,4,256], index: 1, kind: input, shape index: {}]   ;;  %s963_s2 = inlined_call_operand.hbm [shape: f32[2,4,256], index: 2, kind: input, shape index: {}]   ;;  %s964_s3 = inlined_call_operand.hbm [shape: f32[2,2,4,256], index: 3, kind: output, shape index: {}]  }
   0x1   :  { %s498_s14 = scalar_lea.hbm %s961_s0, 16 }
   0x2   :  { %p499_p0 = scmp.ne.s32.totalorder %s961_s0, %s498_s14  ;;  %p502_p1 = scmp.lt.u32.totalorder %s498_s14, %s961_s0 }
   0x4   :  { %p504_p2 = pnand %p502_p1, %p499_p0 }
   0x6   :  { %507 = shalt.err (!%p504_p2)  }
   0x7   :  { %s674_s19 = smov [#allocation3]  }
   0x8   :  { %9 = dma.hbm_to_smem %s961_s0, 16, %s674_s19, [#allocation2] }
   0x9   :  { %628 = dma.done.wait [#allocation2], 16 }
   0xa   :  { %629 = vsyncadd [#allocation2], 4294967280 }
   0xb   :  { %11 = sfence }
   0xc   :  { %12 = vsyncpa [#allocation5], 0 }
   0xd   :  { %14 = vsyncpa [#allocation5 + $0x1], 0 }
   0xe   :  { %15 = vsyncpa [#allocation8], 0 }
   0xf   :  { %17 = vsyncpa [#allocation8 + $0x1], 0 }
  0x10   :  { %18 = vsyncpa [#allocation6], 0 }
  0x11   :  { %20 = vsyncpa [#allocation6 + $0x1], 0  ;;  %s713_s22 = smov 0   ;;  %s715_s23 = smov 0  }
  0x12   :  { %s717_s24 = smov 0   ;;  %s719_s25 = smov 0  }
  0x13   :  { %s721_s26 = smov 0   ;;  %s723_s0 = smov 0  }
  0x14   :  { %s725_s27 = smov 0   ;;  %s727_s28 = smov 0  }
  0x15 LB: > { %s390_s29 = sadd.s32 4294967295, %s672_s28   ;;  %s391_s30 = sadd.s32 4294967294, %s672_s28   ;;  %s672_s28 = sphi %s727_s28, %s26_s28   ;;  %s668_s27 = sphi %s725_s27, %s987_s27   ;;  %s664_s0 = sphi %s723_s0, %s986_s0   ;;  %s660_s26 = sphi %s721_s26, %s985_s26   ;;  %s656_s25 = sphi %s719_s25, %s984_s25   ;;  %s652_s24 = sphi %s717_s24, %s983_s24   ;;  %s648_s23 = sphi %s715_s23, %s982_s23   ;;  %s644_s22 = sphi %s713_s22, %s981_s22  }
  0x16   : > { %s38_s4 = sadd.s32 1, %s664_s0  ;;  %s45_s5 = sadd.s32 1, %s668_s27 }
  0x17   : > { %p39_p3 = scmp.ge.s32.totalorder %s38_s4, 2  ;;  %s56_s6 = sadd.s32 1, %s652_s24 }
  0x18   : > { %p63_p4 = scmp.ne.s32.totalorder %s652_s24, %s648_s23  ;;  %p64_p5 = scmp.eq.s32.totalorder %s672_s28, 0 }
  0x19   : > { %s989_s4 = smov (%p39_p3, %s38_s4), 0  ;;  %s991_s5 = smov (!%p39_p3, %s45_s5), %s668_s27 }
  0x1a   : > { %s52_s7 = ssub.s32 %s664_s0, %s989_s4  ;;  %p766_p6 = por %p64_p5, %p63_p4 }
  0x1b   : > { %p47_p7 = scmp.ge.s32.totalorder %s991_s5, 2  ;;  %p69_p8 = scmp.ne.s32.totalorder %s648_s23, %s644_s22 }
  0x1c   : > { %p70_p9 = scmp.eq.s32.totalorder %s390_s29, 0  ;;  %p127_p10 = scmp.eq.s32.totalorder %s390_s29, 3 }
  0x1d   : > { %s993_s5 = smov (%p47_p7, %s991_s5), 0  ;;  %p133_p13 = scmp.eq.s32.totalorder %s391_s30, 3 }
  0x1e   : > { %p774_p11 = por %p70_p9, %p69_p8  ;;  %p778_p12 = por %p127_p10, %p63_p4 }
  0x1f   : > { %s49_s11 = ssub.s32 %s668_s27, %s993_s5  ;;  %p784_p1 = por %p133_p13, %p69_p8 }
  0x20   : > { %s969_s9 = scalar_select %p774_p11, 1, 0 }
  0x21   : > { %s970_s10 = scalar_select %p778_p12, 1, 0 }
  0x22   : > { %s53_s12 = sor.u32 %s52_s7, %s49_s11  ;;  %p428_p2 = scmp.lt.s32.totalorder %s672_s28, 4 }
  0x23   : > { %p54_p0 = scmp.eq.s32.totalorder %s53_s12, 0  ;;  %s790_s14 = sand.u32 1, %s652_s24  }
  0x24   : > { %s971_s13 = scalar_select %p784_p1, 1, 0 }
  0x25   : > { %s793_s15 = scalar_select %p54_p0, %s652_s24, %s56_s6  }
  0x26   : > { %s965_s16 = sshll.u32 %s790_s14, 2  ;;  %s395_s17 = sshll.u32 %s668_s27, 1 }
  0x27   : > { %s798_s18 = sadd.s32 %s664_s0, %s395_s17  ;;  %s157_s19 = scalar_lea.vmem [#allocation4], %s965_s16 }
  0x28   : > { %s168_s20 = sshll.u32 %s157_s19, 4  ;;  %s396_s21 = sshll.u32 %s798_s18, 6  ;;  %s803_s20 = int_to_ptr.vmem [resolvable:$true] %s168_s20 }
  0x29   : > { %s810_s7 = scalar_lea.hbm %s962_s1, %s396_s21  ;;  %p814_p3 = pnand %p428_p2, %p766_p6 }
  0x2a   : > { %s154_s11 = scalar_lea.sflag [#allocation5], %s790_s14  ;;  %s508_s12 = scalar_lea.hbm %s810_s7, 64 }
  0x2b   : > { %p509_p7 = scmp.ne.s32.totalorder %s810_s7, %s508_s12  ;;  %p510_p8 = pneg %p814_p3 }
  0x2c   : > { %s513_s19 = scalar_lea.hbm %s962_s1, 256  ;;  %p514_p6 = scmp.lt.u32.totalorder %s810_s7, %s962_s1 }
  0x2d   : > { %p511_p9 = pnand %p510_p8, %p509_p7  ;;  %p515_p13 = scmp.lt.u32.totalorder %s513_s19, %s508_s12 }
  0x2e   : > { %p517_p2 = scmp.lt.u32.totalorder %s508_s12, %s810_s7 }
  0x2f   : > { %p512_p10 = pneg %p511_p9  ;;  %p516_p0 = por %p515_p13, %p514_p6 }
  0x31   : > { %p518_p4 = por %p517_p2, %p516_p0 }
  0x33   : > { %p519_p5 = pnand %p518_p4, %p512_p10 }
  0x35   : > { %522 = shalt.err (!%p519_p5)
}
  0x36   : > { %s523_s16 = scalar_lea.vmem %s803_s20, 64  ;;  %s675_s8 = smov [#allocation4]  }
  0x37   : > { %p524_p7 = scmp.ne.s32.totalorder %s803_s20, %s523_s16  ;;  %s528_s17 = sshll.u32 %s675_s8, 4  ;;  %s529_s17 = int_to_ptr.vmem [resolvable:$false] %s528_s17 }
  0x38   : > { %s530_s29 = scalar_lea.vmem %s529_s17, 128  ;;  %p531_p12 = scmp.lt.s32.totalorder %s803_s20, %s529_s17 }
  0x39   : > { %p526_p9 = pnand %p524_p7, %p510_p8  ;;  %p532_p6 = scmp.lt.s32.totalorder %s530_s29, %s523_s16 }
  0x3b   : > { %p527_p1 = pneg %p526_p9  ;;  %p533_p13 = por %p532_p6, %p531_p12 }
  0x3d   : > { %p534_p0 = pnand %p533_p13, %p527_p1 }
  0x3f   : > { %537 = shalt.err (!%p534_p0)
}
  0x40   : > { %420 = dma.hbm_to_vmem [thread:$0]  (!%p814_p3), %s810_s7, 64, %s803_s20, %s154_s11  }
  0x41   : > { %p973_p4 = scmp.lt.s32.totalorder %s672_s28, 5  ;;  %p974_p5 = scmp.ge.s32.totalorder %s672_s28, 1 }
  0x42   : > { %s859_s30 = scalar_lea.hbm %s963_s2, %s396_s21  ;;  %s976_s8 = sshll.u32 %s790_s14, 2 }
  0x43   : > { %p850_p10 = pnand %p974_p5, %p973_p4  ;;  %s179_s17 = scalar_lea.vmem [#allocation7], %s976_s8 }
  0x44   : > { %s190_s29 = sshll.u32 %s179_s17, 4  ;;  %s176_s20 = scalar_lea.sflag [#allocation8], %s790_s14  ;;  %s191_s29 = int_to_ptr.vmem [resolvable:$true] %s190_s29 }
  0x45   : > { %s975_s12 = scalar_select %p850_p10, 1, 0 }
  0x46   : > { %s538_s7 = scalar_lea.hbm %s859_s30, 64  ;;  %s543_s21 = scalar_lea.hbm %s963_s2, 256 }
  0x47   : > { %p539_p12 = scmp.ne.s32.totalorder %s859_s30, %s538_s7  ;;  %p544_p7 = scmp.lt.u32.totalorder %s859_s30, %s963_s2 }
  0x48   : > { %p545_p9 = scmp.lt.u32.totalorder %s543_s21, %s538_s7  ;;  %p547_p13 = scmp.lt.u32.totalorder %s538_s7, %s859_s30 }
  0x49   : > { %p541_p1 = pnand %p539_p12, %p510_p8 }
  0x4a   : > { %p546_p6 = por %p545_p9, %p544_p7 }
  0x4b   : > { %p542_p2 = pneg %p541_p1 }
  0x4c   : > { %p548_p0 = por %p547_p13, %p546_p6 }
  0x4e   : > { %p549_p4 = pnand %p548_p0, %p542_p2 }
  0x50   : > { %552 = shalt.err (!%p549_p4)
}
  0x51   : > { %s553_s14 = scalar_lea.vmem %s191_s29, 64  ;;  %s676_s8 = smov [#allocation7]  }
  0x52   : > { %p554_p5 = scmp.ne.s32.totalorder %s191_s29, %s553_s14  ;;  %s558_s17 = sshll.u32 %s676_s8, 4  ;;  %s559_s17 = int_to_ptr.vmem [resolvable:$false] %s558_s17 }
  0x53   : > { %s560_s18 = scalar_lea.vmem %s559_s17, 128  ;;  %p561_p11 = scmp.lt.s32.totalorder %s191_s29, %s559_s17 }
  0x54   : > { %p556_p12 = pnand %p554_p5, %p510_p8  ;;  %p562_p10 = scmp.lt.s32.totalorder %s560_s18, %s553_s14 }
  0x56   : > { %p557_p1 = pneg %p556_p12  ;;  %p563_p7 = por %p562_p10, %p561_p11 }
  0x58   : > { %p564_p9 = pnand %p563_p7, %p557_p1 }
  0x5a   : > { %567 = shalt.err (!%p564_p9)
}
  0x5b   : > { %423 = dma.hbm_to_vmem [thread:$0]  (!%p814_p3), %s859_s30, 64, %s191_s29, %s176_s20  }
  0x5c   : > { %p977_p2 = scmp.ne.s32.totalorder %s975_s12, 0 }
  0x5d   : > { %s886_s7 = sand.u32 (!%p977_p2), 1, %s648_s23   ;;  %p978_p8 = scmp.ne.s32.totalorder (!%p977_p2), %s969_s9, 0 }
  0x5e   : > { %199 = sbr.rel (%p977_p2) target bundleno = 134 (0x86), region = 28  ;;  %s401_s11 = sshll.u32 (!%p977_p2), %s886_s7, 2 }
  0x5f   : > { %s202_s21 = scalar_lea.sflag (!%p977_p2), [#allocation5], %s886_s7  ;;  %s205_s16 = scalar_lea.vmem (!%p977_p2), [#allocation4], %s401_s11 }
  0x65   : > { %631 = dma.done.wait (%p978_p8), %s202_s21, 64  }
  0x66   : > { %633 = vsyncadd (%p978_p8), %s202_s21, 4294967232  ;;  %s211_s6 = scalar_lea.sflag [#allocation8], %s886_s7  ;;  %s214_s30 = scalar_lea.vmem [#allocation7], %s401_s11 }
  0x67   : > { %635 = dma.done.wait (%p978_p8), %s211_s6, 64  }
  0x68   : > { %637 = vsyncadd (%p978_p8), %s211_s6, 4294967232  ;;  %s403_s12 = sshll.u32 %s886_s7, 3  ;;  %s240_s29 = sld [smem:[#allocation3]]  ;;  %v242_v0 = vld [vmem:[%s205_s16] sm:$0xf] }
  0x69   : > { %s404_s20 = sld [smem:[#allocation3 + $0x1]]  ;;  %s407_s19 = sshll.u32 %s660_s26, 2  ;;  %v243_v2 = vld [vmem:[%s214_s30] sm:$0xf] }
  0x6a   : > { %s239_s14 = scalar_lea.vmem [#allocation9], %s403_s12  ;;  %s265_s17 = sadd.s32 %s656_s25, %s407_s19 }
  0x6b   : > { %s268_s8 = sshll.u32 %s239_s14, 4  ;;  %s408_s18 = sshll.u32 %s265_s17, 6  ;;  %s902_s8 = int_to_ptr.vmem [resolvable:$true] %s268_s8 }
  0x6c   : > { %s907_s26 = scalar_lea.hbm %s964_s3, %s408_s18  ;;  %s252_s25 = scalar_lea.sflag [#allocation6], %s886_s7 }
  0x6d   : > { %s568_s21 = scalar_lea.vmem %s902_s8, 128  ;;  %p979_p3 = scmp.ne.s32.totalorder %s970_s10, 0 }
  0x6e   : > { %v244_v1 = vstv %s240_s29  ;;  %p569_p11 = scmp.ne.s32.totalorder %s902_s8, %s568_s21  ;;  %s677_s16 = smov [#allocation9]  }
  0x6f   : > { %v245_v3 = vmul.f32 %v244_v1, %v242_v0  ;;  %v247_v4 = vstv %s404_s20  ;;  %s572_s6 = sshll.u32 %s677_s16, 4  ;;  %s573_s6 = int_to_ptr.vmem [resolvable:$false] %s572_s6 }
  0x70   : > { %v248_v5 = vmul.f32 %v247_v4, %v243_v2  ;;  %p570_p10 = pnand %p569_p11, %p979_p3  ;;  %s574_s30 = scalar_lea.vmem %s573_s6, 256 }
  0x71   : > { %246 = vst [vmem:[%s239_s14] sm:$0xf] %v245_v3  ;;  %p575_p13 = scmp.lt.s32.totalorder %s902_s8, %s573_s6  ;;  %p576_p0 = scmp.lt.s32.totalorder %s574_s30, %s568_s21 }
  0x72   : > { %405 = vst [vmem:[%s239_s14 + $0x4] sm:$0xf] %v248_v5  ;;  %p571_p6 = pneg %p570_p10 }
  0x73   : > { %p577_p4 = por %p576_p0, %p575_p13 }
  0x75   : > { %p578_p5 = pnand %p577_p4, %p571_p6 }
  0x77   : > { %581 = shalt.err (!%p578_p5)
}
  0x78   : > { %s582_s12 = scalar_lea.hbm %s907_s26, 128  ;;  %s586_s19 = scalar_lea.hbm %s964_s3, 512 }
  0x79   : > { %p583_p12 = scmp.ne.s32.totalorder %s907_s26, %s582_s12  ;;  %p587_p9 = scmp.lt.u32.totalorder %s907_s26, %s964_s3 }
  0x7a   : > { %p588_p2 = scmp.lt.u32.totalorder %s586_s19, %s582_s12  ;;  %p590_p11 = scmp.lt.u32.totalorder %s582_s12, %s907_s26 }
  0x7b   : > { %p584_p1 = pnand %p583_p12, %p979_p3 }
  0x7c   : > { %p589_p8 = por %p588_p2, %p587_p9 }
  0x7d   : > { %p585_p7 = pneg %p584_p1 }
  0x7e   : > { %p591_p10 = por %p590_p11, %p589_p8 }
  0x80   : > { %p592_p6 = pnand %p591_p10, %p585_p7 }
  0x82   : > { %595 = shalt.err (!%p592_p6)
}
  0x83   : > { %s678_s18 = smov 64   ;;  %s679_s9 = smov 128  }
  0x84   : > { %s680_s11 = smov 4  }
  0x85   : > { %415 = dma.vmem_to_hbm [thread:$0]  (%p979_p3), %s902_s8, 128, %s907_s26, %s252_s25, %s678_s18, %s679_s9, %s680_s11  }
  0x86 PF: > { %p429_p13 = scmp.ge.s32.totalorder %s672_s28, 2  ;;  %s283_s21 = sand.u32 1, %s644_s22  }
  0x87   : > { %p980_p0 = scmp.ne.s32.totalorder %s971_s13, 0  ;;  %s284_s16 = scalar_lea.sflag [#allocation6], %s283_s21 }
  0x89   : > { %p425_p4 = pnand %p429_p13, %p980_p0 }
  0x8b   : > { %639 = dma.done.wait (!%p425_p4), %s284_s16, 128  }
  0x8c   : > { %641 = vsyncadd (!%p425_p4), %s284_s16, 4294967168  ;;  %s26_s28 = sadd.s32 1, %s672_s28   ;;  %s981_s22 = smov %s648_s23 }
  0x8d   : > { %p23_p5 = scmp.ge.s32.totalorder %s26_s28, 6   ;;  %s982_s23 = smov %s652_s24 }
  0x8e   : > { %s983_s24 = smov %s793_s15  ;;  %s984_s25 = smov %s664_s0 }
  0x8f   : > { %s985_s26 = smov %s668_s27  ;;  %s986_s0 = smov %s989_s4 }
  0x90   : > { %s987_s27 = smov %s993_s5  ;;  %25 = sbr.rel (!%p23_p5) target bundleno = 21 (0x15), region = 87 }
  0x97   :  { %289 = vsyncpa [#allocation5], 1 }
  0x98   :  { %291 = vsyncpa [#allocation5 + $0x1], 1 }
  0x99   :  { %292 = vsyncpa [#allocation8], 1 }
  0x9a   :  { %294 = vsyncpa [#allocation8 + $0x1], 1 }
  0x9b   :  { %295 = vsyncpa [#allocation6], 1 }
  0x9c   :  { %297 = vsyncpa [#allocation6 + $0x1], 1 }

</bundles_post_ra>
